<compile_context>
chip_gen: v7x
topology: tpu7x:2x2x1
jax: 0.10.0
libtpu: 0.0.40
codegen_flags: <defaults>
</compile_context>

<pallas_src>
import functools
import math

import jax
import jax.numpy as jnp
from jax.experimental import pallas as pl
from jax.experimental.pallas import tpu as pltpu


def _round_up(a, b):
    return ((a + b - 1) // b) * b


def _cdiv(a, b):
    return -(-a // b)


def _quantize_kernel(x_ref, erep_ref, e2h_ref, q_ref, ind_ref, sse_ref,
                     *, dim, n_embed, pack, n_valid):
    """One grid step handles a (R, pack*dim) lane-dense tile of packed rows.

    x_ref:    (R, pack*dim)       x.dtype packed input rows (lane-dense)
    erep_ref: (pack*dim, pack*K)  f32     block-diagonal replicated codebook
    e2h_ref:  (1, pack*K)         f32     0.5*||embed_k||^2 tiled per segment
    q_ref:    (R, pack*dim)       x.dtype quantized output (same packed layout)
    ind_ref:  (R, pack)           i32     code index of logical row pack*j + s
    sse_ref:  (8, 128)            f32     per-tile partial sum of squared error
    """
    i = pl.program_id(0)
    xf = x_ref[...].astype(jnp.float32)
    erep = erep_ref[...]
    e2h = e2h_ref[...]

    rows = xf.shape[0]
    big_k = pack * n_embed

    # 0.5*||x - e_k||^2 up to a per-row constant: 0.5*||e_k||^2 - <x, e_k>.
    # TODO(synk): optional bf16 cast of xf/erep here is a v5e MXU win but can
    #             flip argmin on near-exact ties; kept f32 for index parity.
    xe = jnp.dot(xf, erep, preferred_element_type=jnp.float32)      # (R, big_k)
    dist = e2h - xe

    # (1, big_k) helper rows: sublane-broadcast inside the full-width compares
    # and selects below, instead of materializing (rows, big_k) masks.
    lane1 = jax.lax.broadcasted_iota(jnp.int32, (1, big_k), 1)
    inf = jnp.float32(jnp.inf)

    onehot = jnp.zeros((rows, big_k), jnp.float32)
    ind_cols = []
    for s in range(pack):                       # static unroll, pack = 128 // dim
        lo = s * n_embed
        if pack == 1:
            dist_s = dist
        else:
            seg_bias = jnp.where((lane1 >= lo) & (lane1 < lo + n_embed),
                                 jnp.float32(0), inf)           # (1, big_k)
            dist_s = dist + seg_bias            # +inf outside segment s
        m_s = jnp.min(dist_s, axis=1, keepdims=True)            # (R, 1)
        # Ties resolve to the smallest index (matches torch argmin).  NaN rows
        # produce garbage but only occur in padded/OOB rows, which are dropped.
        cand = jnp.where(dist_s <= m_s, lane1 - lo, n_embed)    # (R, big_k) i32
        ind_s = jnp.min(cand, axis=1, keepdims=True)            # (R, 1)
        onehot = jnp.where(cand == ind_s, jnp.float32(1), onehot)
        ind_cols.append(ind_s)

    # Gather codebook vectors straight into the packed lane-dense layout: the
    # block-diagonal codebook routes each segment's code into its own dim-slot.
    # Contract on erep's second axis (onehot @ erep^T) so no transposed copy of
    # the replicated codebook is kept resident in VMEM.
    quant = jax.lax.dot_general(onehot, erep, (((1,), (1,)), ((), ())),
                                preferred_element_type=jnp.float32)
    q_ref[...] = quant.astype(q_ref.dtype)

    # Pack indices: column s = code id of logical row pack*j + s.
    col = jax.lax.broadcasted_iota(jnp.int32, (rows, pack), 1)
    ind_packed = jnp.zeros((rows, pack), jnp.int32)
    for s in range(pack):
        ind_packed = jnp.where(col == s, ind_cols[s], ind_packed)
    ind_ref[...] = ind_packed

    # Per-tile partial SSE (summed in the wrapper) keeps the grid "parallel".
    d = quant - xf
    sq = d * d
    if n_valid is None:                         # static: input fills the grid
        sse_ref[...] = jnp.broadcast_to(jnp.sum(sq), (8, 128))
    else:
        last = pl.num_programs(0) - 1

        @pl.when(i != last)
        def _():
            sse_ref[...] = jnp.broadcast_to(jnp.sum(sq), (8, 128))

        @pl.when(i == last)
        def _():
            # Only the final tile carries padded / out-of-bounds rows.
            sub = jax.lax.broadcasted_iota(jnp.int32, sq.shape, 0)
            lane_q = jax.lax.broadcasted_iota(jnp.int32, sq.shape, 1)
            seg_idx = lane_q // dim if pack > 1 else 0
            logical = (i * rows + sub) * pack + seg_idx
            sq_m = jnp.where(logical < n_valid, sq, jnp.float32(0))
            sse_ref[...] = jnp.broadcast_to(jnp.sum(sq_m), (8, 128))


@functools.partial(jax.jit, static_argnames=("block_rows",))
def quantize_forward(x, embed, block_rows=1024):
    """x: (..., dim) channels-last activations.  embed: (dim, n_embed)."""
    lead_shape = x.shape[:-1]
    dim = x.shape[-1]
    n_embed = embed.shape[1]
    assert (128 % dim == 0) or (dim % 128 == 0), \
        "dim must divide 128 or be a multiple of 128"  # TODO(synk): general dims
    pack = 128 // dim if dim < 128 else 1
    lane_w = pack * dim
    big_k = pack * n_embed

    n = math.prod(lead_shape)
    flat = x.reshape(n, dim)                        # native dtype, no astype

    packed_needed = _cdiv(n, pack)
    if packed_needed * pack != n:
        # Pad only to the pack boundary (<= pack-1 rows); block raggedness is
        # handled by the grid itself.  TODO(synk): even this small pad is a
        # full-tensor XLA copy; a manual-DMA tail path would remove it.
        flat = jnp.pad(flat, ((0, packed_needed * pack - n), (0, 0)))
    x_dense = flat.reshape(packed_needed, lane_w)   # lane-dense packed rows

    embed_f = embed.astype(jnp.float32)
    if pack > 1:
        # Block-diagonal replication: erep[s*dim + d, s*K + k] = embed[d, k]
        erep = jnp.kron(jnp.eye(pack, dtype=jnp.float32), embed_f)
    else:
        erep = embed_f
    e2h = 0.5 * jnp.sum(erep * erep, axis=0, keepdims=True)   # (1, big_k)

    # Tile rows: large enough to amortize per-step overhead, but always >= 2
    # grid steps when the input allows it so v7x's two TensorCores share work.
    br_cap = _round_up(max(_cdiv(packed_needed, 2), 1), 8)
    br = max(8, min(_round_up(block_rows, 8), br_cap))
    grid = _cdiv(packed_needed, br)
    ragged = (grid * br * pack != n)     # last tile has padded / OOB rows

    kernel = functools.partial(
        _quantize_kernel, dim=dim, n_embed=n_embed, pack=pack,
        n_valid=(n if ragged else None))

    # TODO(synk): for very large codebooks (n_embed >= 4096) the replicated
    #             codebook's double-buffered VMEM grows with pack; single-buffer
    #             it (pl.Buffered(1)) or fall back to the unpacked layout there.
    q_dense, ind_packed, sse_part = pl.pallas_call(
        kernel,
        out_shape=(
            jax.ShapeDtypeStruct((packed_needed, lane_w), x.dtype),
            jax.ShapeDtypeStruct((packed_needed, pack), jnp.int32),
            jax.ShapeDtypeStruct((grid * 8, 128), jnp.float32),
        ),
        grid_spec=pltpu.PrefetchScalarGridSpec(
            num_scalar_prefetch=0,
            grid=(grid,),
            in_specs=[
                pl.BlockSpec((br, lane_w), lambda i: (i, 0)),
                pl.BlockSpec((lane_w, big_k), lambda i: (0, 0)),
                pl.BlockSpec((1, big_k), lambda i: (0, 0)),
            ],
            out_specs=(
                pl.BlockSpec((br, lane_w), lambda i: (i, 0)),
                pl.BlockSpec((br, pack), lambda i: (i, 0)),
                pl.BlockSpec((8, 128), lambda i: (i, 0)),
            ),
        ),
        compiler_params=pltpu.CompilerParams(
            dimension_semantics=("parallel",),     # no cross-step carries
            vmem_limit_bytes=32 * 1024 * 1024,
        ),
    )(x_dense, erep, e2h)

    quantize = q_dense.reshape(packed_needed * pack, dim)[:n].reshape(x.shape)
    embed_ind = ind_packed.reshape(-1)[:n].reshape(lead_shape)
    sse = jnp.sum(sse_part[::8, 0])
    diff = (sse / jnp.float32(n * dim)).astype(x.dtype)

    # Forward value of `x + stop_gradient(quantize - x)` equals `quantize`;
    # return it directly to avoid an extra full-tensor HBM pass (see TODOs).
    return quantize, diff, embed_ind


def _reference(x, embed):
    """Plain-JAX reference mirroring the PyTorch forward (eval path)."""
    dim = x.shape[-1]
    flat = x.reshape(-1, dim)
    dist = (
        jnp.sum(flat**2, axis=1, keepdims=True)
        - 2.0 * flat @ embed
        + jnp.sum(embed**2, axis=0, keepdims=True)
    )
    ind = jnp.argmin(dist, axis=1)
    quant = embed.T[ind].reshape(x.shape)
    diff = jnp.mean((quant - x) ** 2)
    return quant, diff, ind.reshape(x.shape[:-1])


if __name__ == "__main__":
    dim, n_embed = 32, 64
    key = jax.random.PRNGKey(0)
    kx, ke, kx2 = jax.random.split(key, 3)

    # Main small example: NHWC activations (2, 8, 8, 32), codebook (32, 64).
    x = jax.random.normal(kx, (2, 8, 8, dim), dtype=jnp.float32)
    embed = jax.random.normal(ke, (dim, n_embed), dtype=jnp.float32)

    quantize, diff, embed_ind = quantize_forward(x, embed)
    jax.block_until_ready((quantize, diff, embed_ind))

    q_ref, d_ref, i_ref = _reference(x, embed)
    assert jnp.array_equal(embed_ind, i_ref), "index mismatch"
    assert jnp.allclose(quantize, q_ref, atol=1e-5, rtol=1e-5), "quantize mismatch"
    assert jnp.allclose(diff, d_ref, atol=1e-5, rtol=1e-5), "diff mismatch"

    # Ragged case (N = 105 does not fill packed rows or the last block)
    # exercises the pack-boundary pad + pl.when-gated masked-SSE tail path.
    x2 = jax.random.normal(kx2, (3, 5, 7, dim), dtype=jnp.float32)
    q2, d2, i2 = quantize_forward(x2, embed)
    jax.block_until_ready((q2, d2, i2))
    q2r, d2r, i2r = _reference(x2, embed)
    assert jnp.array_equal(i2, i2r), "ragged index mismatch"
    assert jnp.allclose(q2, q2r, atol=1e-5, rtol=1e-5), "ragged quantize mismatch"
    assert jnp.allclose(d2, d2r, atol=1e-5, rtol=1e-5), "ragged diff mismatch"

    print("KERNEL_OK")
</pallas_src>

<mosaic_0001>
module attributes {stable_mosaic.version = 11 : i64} {
  func.func @_quantize_kernel(%arg0: i32, %arg1: memref<16x128xf32, #tpu.memory_space<vmem>>, %arg2: memref<128x256xf32, #tpu.memory_space<vmem>>, %arg3: memref<1x256xf32, #tpu.memory_space<vmem>>, %arg4: memref<16x128xf32, #tpu.memory_space<vmem>>, %arg5: memref<16x4xi32, #tpu.memory_space<vmem>>, %arg6: memref<8x128xf32, #tpu.memory_space<vmem>>) attributes {dimension_semantics = [#tpu.dimension_semantics<parallel>], iteration_bounds = array<i64: 2>, scalar_prefetch = 0 : i64, scratch_operands = 0 : i64, tpu.core_type = #tpu.core_type<tc>, window_params = [{transform_indices = @transform_0, window_bounds = array<i64: 16, 128>}, {pipeline_mode = #tpu.pipeline_mode<synchronous>, transform_indices = @transform_1, window_bounds = array<i64: 128, 256>}, {pipeline_mode = #tpu.pipeline_mode<synchronous>, transform_indices = @transform_2, window_bounds = array<i64: 1, 256>}, {transform_indices = @transform_3, window_bounds = array<i64: 16, 128>}, {transform_indices = @transform_4, window_bounds = array<i64: 16, 4>}, {transform_indices = @transform_5, window_bounds = array<i64: 8, 128>}]} {
    %c0 = arith.constant 0 : index
    %c0_0 = arith.constant 0 : index
    %0 = vector.load %arg1[%c0, %c0_0] : memref<16x128xf32, #tpu.memory_space<vmem>>, vector<16x128xf32>
    %c0_1 = arith.constant 0 : index
    %c0_2 = arith.constant 0 : index
    %1 = vector.load %arg2[%c0_1, %c0_2] : memref<128x256xf32, #tpu.memory_space<vmem>>, vector<128x256xf32>
    %c0_3 = arith.constant 0 : index
    %c0_4 = arith.constant 0 : index
    %2 = vector.load %arg3[%c0_3, %c0_4] : memref<1x256xf32, #tpu.memory_space<vmem>>, vector<1x256xf32>
    %cst = arith.constant dense<0.000000e+00> : vector<16x256xf32>
    %3 = tpu.matmul %0, %1, %cst {dimension_numbers = #tpu.dot_dimension_numbers<[1], [0], [0], [1], [0, 0, 1, 1], [], []>} : vector<16x128xf32>, vector<128x256xf32>, vector<16x256xf32> -> vector<16x256xf32>
    %4 = vector.broadcast %2 : vector<1x256xf32> to vector<16x256xf32>
    %5 = arith.subf %4, %3 : vector<16x256xf32>
    %6 = tpu.iota {dimensions = array<i32: 1>} : vector<1x256xi32>
    %cst_5 = arith.constant 0.000000e+00 : f32
    %7 = vector.broadcast %cst_5 : f32 to vector<16x256xf32>
    %c0_i32 = arith.constant 0 : i32
    %8 = vector.broadcast %c0_i32 : i32 to vector<1x256xi32>
    %9 = arith.cmpi sge, %6, %8 : vector<1x256xi32>
    %c64_i32 = arith.constant 64 : i32
    %10 = vector.broadcast %c64_i32 : i32 to vector<1x256xi32>
    %11 = arith.cmpi slt, %6, %10 : vector<1x256xi32>
    %12 = arith.andi %9, %11 : vector<1x256xi1>
    %cst_6 = arith.constant 0.000000e+00 : f32
    %cst_7 = arith.constant 0x7F800000 : f32
    %13 = vector.broadcast %cst_6 : f32 to vector<1x256xf32>
    %14 = vector.broadcast %cst_7 : f32 to vector<1x256xf32>
    %15 = arith.select %12, %13, %14 : vector<1x256xi1>, vector<1x256xf32>
    %16 = vector.broadcast %15 : vector<1x256xf32> to vector<16x256xf32>
    %17 = arith.addf %5, %16 : vector<16x256xf32>
    %cst_8 = arith.constant dense<0x7F800000> : vector<16xf32>
    %18 = vector.multi_reduction <minimumf>, %17, %cst_8 [1] : vector<16x256xf32> to vector<16xf32>
    %19 = vector.shape_cast %18 : vector<16xf32> to vector<16x1xf32>
    %20 = vector.broadcast %19 : vector<16x1xf32> to vector<16x256xf32>
    %21 = arith.cmpf ole, %17, %20 : vector<16x256xf32>
    %c0_i32_9 = arith.constant 0 : i32
    %22 = vector.broadcast %c0_i32_9 : i32 to vector<1x256xi32>
    %23 = arith.subi %6, %22 : vector<1x256xi32>
    %c64_i32_10 = arith.constant 64 : i32
    %24 = vector.shape_cast %23 : vector<1x256xi32> to vector<1x256xi32>
    %25 = vector.broadcast %24 : vector<1x256xi32> to vector<16x256xi32>
    %26 = vector.broadcast %c64_i32_10 : i32 to vector<16x256xi32>
    %27 = arith.select %21, %25, %26 : vector<16x256xi1>, vector<16x256xi32>
    %cst_11 = arith.constant dense<2147483647> : vector<16xi32>
    %28 = vector.multi_reduction <minsi>, %27, %cst_11 [1] : vector<16x256xi32> to vector<16xi32>
    %29 = vector.shape_cast %28 : vector<16xi32> to vector<16x1xi32>
    %30 = vector.broadcast %29 : vector<16x1xi32> to vector<16x256xi32>
    %31 = arith.cmpi eq, %27, %30 : vector<16x256xi32>
    %cst_12 = arith.constant 1.000000e+00 : f32
    %32 = vector.broadcast %cst_12 : f32 to vector<16x256xf32>
    %33 = arith.select %31, %32, %7 : vector<16x256xi1>, vector<16x256xf32>
    %c64_i32_13 = arith.constant 64 : i32
    %34 = vector.broadcast %c64_i32_13 : i32 to vector<1x256xi32>
    %35 = arith.cmpi sge, %6, %34 : vector<1x256xi32>
    %c128_i32 = arith.constant 128 : i32
    %36 = vector.broadcast %c128_i32 : i32 to vector<1x256xi32>
    %37 = arith.cmpi slt, %6, %36 : vector<1x256xi32>
    %38 = arith.andi %35, %37 : vector<1x256xi1>
    %cst_14 = arith.constant 0.000000e+00 : f32
    %cst_15 = arith.constant 0x7F800000 : f32
    %39 = vector.broadcast %cst_14 : f32 to vector<1x256xf32>
    %40 = vector.broadcast %cst_15 : f32 to vector<1x256xf32>
    %41 = arith.select %38, %39, %40 : vector<1x256xi1>, vector<1x256xf32>
    %42 = vector.broadcast %41 : vector<1x256xf32> to vector<16x256xf32>
    %43 = arith.addf %5, %42 : vector<16x256xf32>
    %cst_16 = arith.constant dense<0x7F800000> : vector<16xf32>
    %44 = vector.multi_reduction <minimumf>, %43, %cst_16 [1] : vector<16x256xf32> to vector<16xf32>
    %45 = vector.shape_cast %44 : vector<16xf32> to vector<16x1xf32>
    %46 = vector.broadcast %45 : vector<16x1xf32> to vector<16x256xf32>
    %47 = arith.cmpf ole, %43, %46 : vector<16x256xf32>
    %c64_i32_17 = arith.constant 64 : i32
    %48 = vector.broadcast %c64_i32_17 : i32 to vector<1x256xi32>
    %49 = arith.subi %6, %48 : vector<1x256xi32>
    %c64_i32_18 = arith.constant 64 : i32
    %50 = vector.shape_cast %49 : vector<1x256xi32> to vector<1x256xi32>
    %51 = vector.broadcast %50 : vector<1x256xi32> to vector<16x256xi32>
    %52 = vector.broadcast %c64_i32_18 : i32 to vector<16x256xi32>
    %53 = arith.select %47, %51, %52 : vector<16x256xi1>, vector<16x256xi32>
    %cst_19 = arith.constant dense<2147483647> : vector<16xi32>
    %54 = vector.multi_reduction <minsi>, %53, %cst_19 [1] : vector<16x256xi32> to vector<16xi32>
    %55 = vector.shape_cast %54 : vector<16xi32> to vector<16x1xi32>
    %56 = vector.broadcast %55 : vector<16x1xi32> to vector<16x256xi32>
    %57 = arith.cmpi eq, %53, %56 : vector<16x256xi32>
    %cst_20 = arith.constant 1.000000e+00 : f32
    %58 = vector.broadcast %cst_20 : f32 to vector<16x256xf32>
    %59 = arith.select %57, %58, %33 : vector<16x256xi1>, vector<16x256xf32>
    %c128_i32_21 = arith.constant 128 : i32
    %60 = vector.broadcast %c128_i32_21 : i32 to vector<1x256xi32>
    %61 = arith.cmpi sge, %6, %60 : vector<1x256xi32>
    %c192_i32 = arith.constant 192 : i32
    %62 = vector.broadcast %c192_i32 : i32 to vector<1x256xi32>
    %63 = arith.cmpi slt, %6, %62 : vector<1x256xi32>
    %64 = arith.andi %61, %63 : vector<1x256xi1>
    %cst_22 = arith.constant 0.000000e+00 : f32
    %cst_23 = arith.constant 0x7F800000 : f32
    %65 = vector.broadcast %cst_22 : f32 to vector<1x256xf32>
    %66 = vector.broadcast %cst_23 : f32 to vector<1x256xf32>
    %67 = arith.select %64, %65, %66 : vector<1x256xi1>, vector<1x256xf32>
    %68 = vector.broadcast %67 : vector<1x256xf32> to vector<16x256xf32>
    %69 = arith.addf %5, %68 : vector<16x256xf32>
    %cst_24 = arith.constant dense<0x7F800000> : vector<16xf32>
    %70 = vector.multi_reduction <minimumf>, %69, %cst_24 [1] : vector<16x256xf32> to vector<16xf32>
    %71 = vector.shape_cast %70 : vector<16xf32> to vector<16x1xf32>
    %72 = vector.broadcast %71 : vector<16x1xf32> to vector<16x256xf32>
    %73 = arith.cmpf ole, %69, %72 : vector<16x256xf32>
    %c128_i32_25 = arith.constant 128 : i32
    %74 = vector.broadcast %c128_i32_25 : i32 to vector<1x256xi32>
    %75 = arith.subi %6, %74 : vector<1x256xi32>
    %c64_i32_26 = arith.constant 64 : i32
    %76 = vector.shape_cast %75 : vector<1x256xi32> to vector<1x256xi32>
    %77 = vector.broadcast %76 : vector<1x256xi32> to vector<16x256xi32>
    %78 = vector.broadcast %c64_i32_26 : i32 to vector<16x256xi32>
    %79 = arith.select %73, %77, %78 : vector<16x256xi1>, vector<16x256xi32>
    %cst_27 = arith.constant dense<2147483647> : vector<16xi32>
    %80 = vector.multi_reduction <minsi>, %79, %cst_27 [1] : vector<16x256xi32> to vector<16xi32>
    %81 = vector.shape_cast %80 : vector<16xi32> to vector<16x1xi32>
    %82 = vector.broadcast %81 : vector<16x1xi32> to vector<16x256xi32>
    %83 = arith.cmpi eq, %79, %82 : vector<16x256xi32>
    %cst_28 = arith.constant 1.000000e+00 : f32
    %84 = vector.broadcast %cst_28 : f32 to vector<16x256xf32>
    %85 = arith.select %83, %84, %59 : vector<16x256xi1>, vector<16x256xf32>
    %c192_i32_29 = arith.constant 192 : i32
    %86 = vector.broadcast %c192_i32_29 : i32 to vector<1x256xi32>
    %87 = arith.cmpi sge, %6, %86 : vector<1x256xi32>
    %c256_i32 = arith.constant 256 : i32
    %88 = vector.broadcast %c256_i32 : i32 to vector<1x256xi32>
    %89 = arith.cmpi slt, %6, %88 : vector<1x256xi32>
    %90 = arith.andi %87, %89 : vector<1x256xi1>
    %cst_30 = arith.constant 0.000000e+00 : f32
    %cst_31 = arith.constant 0x7F800000 : f32
    %91 = vector.broadcast %cst_30 : f32 to vector<1x256xf32>
    %92 = vector.broadcast %cst_31 : f32 to vector<1x256xf32>
    %93 = arith.select %90, %91, %92 : vector<1x256xi1>, vector<1x256xf32>
    %94 = vector.broadcast %93 : vector<1x256xf32> to vector<16x256xf32>
    %95 = arith.addf %5, %94 : vector<16x256xf32>
    %cst_32 = arith.constant dense<0x7F800000> : vector<16xf32>
    %96 = vector.multi_reduction <minimumf>, %95, %cst_32 [1] : vector<16x256xf32> to vector<16xf32>
    %97 = vector.shape_cast %96 : vector<16xf32> to vector<16x1xf32>
    %98 = vector.broadcast %97 : vector<16x1xf32> to vector<16x256xf32>
    %99 = arith.cmpf ole, %95, %98 : vector<16x256xf32>
    %c192_i32_33 = arith.constant 192 : i32
    %100 = vector.broadcast %c192_i32_33 : i32 to vector<1x256xi32>
    %101 = arith.subi %6, %100 : vector<1x256xi32>
    %c64_i32_34 = arith.constant 64 : i32
    %102 = vector.shape_cast %101 : vector<1x256xi32> to vector<1x256xi32>
    %103 = vector.broadcast %102 : vector<1x256xi32> to vector<16x256xi32>
    %104 = vector.broadcast %c64_i32_34 : i32 to vector<16x256xi32>
    %105 = arith.select %99, %103, %104 : vector<16x256xi1>, vector<16x256xi32>
    %cst_35 = arith.constant dense<2147483647> : vector<16xi32>
    %106 = vector.multi_reduction <minsi>, %105, %cst_35 [1] : vector<16x256xi32> to vector<16xi32>
    %107 = vector.shape_cast %106 : vector<16xi32> to vector<16x1xi32>
    %108 = vector.broadcast %107 : vector<16x1xi32> to vector<16x256xi32>
    %109 = arith.cmpi eq, %105, %108 : vector<16x256xi32>
    %cst_36 = arith.constant 1.000000e+00 : f32
    %110 = vector.broadcast %cst_36 : f32 to vector<16x256xf32>
    %111 = arith.select %109, %110, %85 : vector<16x256xi1>, vector<16x256xf32>
    %cst_37 = arith.constant dense<0.000000e+00> : vector<16x128xf32>
    %112 = tpu.matmul %111, %1, %cst_37 {dimension_numbers = #tpu.dot_dimension_numbers<[1], [1], [0], [0], [0, 0, 1, 0], [], []>} : vector<16x256xf32>, vector<128x256xf32>, vector<16x128xf32> -> vector<16x128xf32>
    %c0_38 = arith.constant 0 : index
    %c0_39 = arith.constant 0 : index
    %113 = vector.load %arg4[%c0_38, %c0_39] : memref<16x128xf32, #tpu.memory_space<vmem>>, vector<16x128xf32>
    tpu.vector_store %arg4[%c0_38, %c0_39], %112 {strides = array<i32>} : memref<16x128xf32, #tpu.memory_space<vmem>>, vector<16x128xf32>,
    %114 = tpu.iota {dimensions = array<i32: 1>} : vector<16x4xi32>
    %c0_i32_40 = arith.constant 0 : i32
    %115 = vector.broadcast %c0_i32_40 : i32 to vector<16x4xi32>
    %c0_i32_41 = arith.constant 0 : i32
    %116 = vector.broadcast %c0_i32_41 : i32 to vector<16x4xi32>
    %117 = arith.cmpi eq, %114, %116 : vector<16x4xi32>
    %118 = vector.shape_cast %29 : vector<16x1xi32> to vector<16x1xi32>
    %119 = vector.broadcast %118 : vector<16x1xi32> to vector<16x4xi32>
    %120 = arith.select %117, %119, %115 : vector<16x4xi1>, vector<16x4xi32>
    %c1_i32 = arith.constant 1 : i32
    %121 = vector.broadcast %c1_i32 : i32 to vector<16x4xi32>
    %122 = arith.cmpi eq, %114, %121 : vector<16x4xi32>
    %123 = vector.shape_cast %55 : vector<16x1xi32> to vector<16x1xi32>
    %124 = vector.broadcast %123 : vector<16x1xi32> to vector<16x4xi32>
    %125 = arith.select %122, %124, %120 : vector<16x4xi1>, vector<16x4xi32>
    %c2_i32 = arith.constant 2 : i32
    %126 = vector.broadcast %c2_i32 : i32 to vector<16x4xi32>
    %127 = arith.cmpi eq, %114, %126 : vector<16x4xi32>
    %128 = vector.shape_cast %81 : vector<16x1xi32> to vector<16x1xi32>
    %129 = vector.broadcast %128 : vector<16x1xi32> to vector<16x4xi32>
    %130 = arith.select %127, %129, %125 : vector<16x4xi1>, vector<16x4xi32>
    %c3_i32 = arith.constant 3 : i32
    %131 = vector.broadcast %c3_i32 : i32 to vector<16x4xi32>
    %132 = arith.cmpi eq, %114, %131 : vector<16x4xi32>
    %133 = vector.shape_cast %107 : vector<16x1xi32> to vector<16x1xi32>
    %134 = vector.broadcast %133 : vector<16x1xi32> to vector<16x4xi32>
    %135 = arith.select %132, %134, %130 : vector<16x4xi1>, vector<16x4xi32>
    %c0_42 = arith.constant 0 : index
    %c0_43 = arith.constant 0 : index
    %136 = vector.load %arg5[%c0_42, %c0_43] : memref<16x4xi32, #tpu.memory_space<vmem>>, vector<16x4xi32>
    tpu.vector_store %arg5[%c0_42, %c0_43], %135 {strides = array<i32>} : memref<16x4xi32, #tpu.memory_space<vmem>>, vector<16x4xi32>,
    %137 = arith.subf %112, %0 : vector<16x128xf32>
    %138 = arith.mulf %137, %137 : vector<16x128xf32>
    %139 = vector.shape_cast %138 : vector<16x128xf32> to vector<1x16x128xf32>
    %cst_44 = arith.constant dense<0.000000e+00> : vector<1xf32>
    %140 = vector.multi_reduction <add>, %139, %cst_44 [1, 2] : vector<1x16x128xf32> to vector<1xf32>
    %141 = vector.shape_cast %140 : vector<1xf32> to vector<1x1x1xf32>
    %142 = vector.extract %141[0, 0, 0] : f32 from vector<1x1x1xf32>
    %143 = vector.broadcast %142 : f32 to vector<8x128xf32>
    %c0_45 = arith.constant 0 : index
    %c0_46 = arith.constant 0 : index
    %144 = vector.load %arg6[%c0_45, %c0_46] : memref<8x128xf32, #tpu.memory_space<vmem>>, vector<8x128xf32>
    tpu.vector_store %arg6[%c0_45, %c0_46], %143 {strides = array<i32>} : memref<8x128xf32, #tpu.memory_space<vmem>>, vector<8x128xf32>,
    return
  }
  func.func @transform_0(%arg0: i32) -> (i32, i32) {
    %c0_i32 = arith.constant 0 : i32
    %c0_i32_0 = arith.constant 0 : i32
    return %arg0, %c0_i32 : i32, i32
  }
  func.func @transform_1(%arg0: i32) -> (i32, i32) {
    %c0_i32 = arith.constant 0 : i32
    %c0_i32_0 = arith.constant 0 : i32
    %c0_i32_1 = arith.constant 0 : i32
    return %c0_i32, %c0_i32_0 : i32, i32
  }
  func.func @transform_2(%arg0: i32) -> (i32, i32) {
    %c0_i32 = arith.constant 0 : i32
    %c0_i32_0 = arith.constant 0 : i32
    %c0_i32_1 = arith.constant 0 : i32
    return %c0_i32, %c0_i32_0 : i32, i32
  }
  func.func @transform_3(%arg0: i32) -> (i32, i32) {
    %c0_i32 = arith.constant 0 : i32
    %c0_i32_0 = arith.constant 0 : i32
    return %arg0, %c0_i32 : i32, i32
  }
  func.func @transform_4(%arg0: i32) -> (i32, i32) {
    %c0_i32 = arith.constant 0 : i32
    %c0_i32_0 = arith.constant 0 : i32
    return %arg0, %c0_i32 : i32, i32
  }
  func.func @transform_5(%arg0: i32) -> (i32, i32) {
    %c0_i32 = arith.constant 0 : i32
    %c0_i32_0 = arith.constant 0 : i32
    return %arg0, %c0_i32 : i32, i32
  }
}

</mosaic_0001>

<bundles_post_ra>
// kernel: quantize_forward.1
= control target key start
LH: loop header
LB: loop body
LE: loop exit
PB: predicated region body
PF: predicated region fallthrough
CT: control target
= control target key end

     0   :  { %s1015_s18 = smov 0   ;;  %s1322_s0 = inlined_call_operand.vmem [shape: f32[32,128], index: 0, kind: input, shape index: {}]   ;;  %s1323_s1 = inlined_call_operand.vmem [shape: f32[128,256], index: 1, kind: input, shape index: {}]   ;;  %s1324_s2 = inlined_call_operand.vmem [shape: f32[1,256], index: 2, kind: input, shape index: {}]   ;;  %s1325_s3 = inlined_call_operand.vmem [shape: f32[32,128], index: 3, kind: output, shape index: {0}]   ;;  %s1326_s4 = inlined_call_operand.vmem [shape: s32[32,4], index: 4, kind: output, shape index: {1}]   ;;  %s1327_s5 = inlined_call_operand.vmem [shape: f32[16,128], index: 5, kind: output, shape index: {2}]  }
   0x1 LB: > { %s1021_s19 = sadd.s32 4294967295, %s981_s18   ;;  %p884_p0 = scmp.ge.s32.totalorder %s981_s18, 1  ;;  %s981_s18 = sphi %s1015_s18, %s16_s18  }
   0x2   : > { %p193_p1 = scmp.lt.s32.totalorder %s981_s18, 3 }
   0x4   : > { %p194_p2 = pnand %p884_p0, %p193_p1 }
   0x5   : > { %v255_v0 = vld [vmem:[%s1323_s1 + $0x8] sm:$0xff] (!%p194_p2)  ;;  %v257_v1 = vld [vmem:[%s1323_s1 + $0x18] sm:$0xff] (!%p194_p2)  ;;  %v254_v2 = vld [vmem:[%s1323_s1] sm:$0xff] (!%p194_p2)  ;;  %v983_v7 = vmov (!%p194_p2), 0.0   ;;  %s885_s16 = sshll.u32 (!%p194_p2), %s1021_s19, 1  ;;  %v365_v51 = vlaneseq (!%p194_p2)  ;;  %v984_v61 = vmov (!%p194_p2), inf  }
   0x6   : > { %197 = sbr.rel (%p194_p2) target bundleno = 1146 (0x47a), region = 32  ;;  %v899_v3 = vpack.c.bf16 (!%p194_p2), %v257_v1, %v255_v0  ;;  %v256_v4 = vld [vmem:[%s1323_s1 + $0x10] sm:$0xff] (!%p194_p2)  ;;  %v259_v5 = vld [vmem:[%s1323_s1 + $0x28] sm:$0xff] (!%p194_p2)  ;;  %v261_v6 = vld [vmem:[%s1323_s1 + $0x38] sm:$0xff] (!%p194_p2)  ;;  %351 = vmatprep.mubr.f32.mxu0 (!%p194_p2), %v983_v7  ;;  %p231_p3 = scmp.lt.s32.totalorder (!%p194_p2), %s885_s16, 3 }
   0x7   : > { %v901_v8 = vpack.c.bf16 (!%p194_p2), %v256_v4, %v254_v2  ;;  %v903_v9 = vpack.c.bf16 (!%p194_p2), %v261_v6, %v259_v5  ;;  %v258_v10 = vld [vmem:[%s1323_s1 + $0x20] sm:$0xff] (!%p194_p2)  ;;  %v260_v11 = vld [vmem:[%s1323_s1 + $0x30] sm:$0xff] (!%p194_p2)  ;;  %v263_v12 = vld [vmem:[%s1323_s1 + $0x48] sm:$0xff] (!%p194_p2)  ;;  %v366_v52 = vshrl.u32 (!%p194_p2), %v365_v51, 7  ;;  %v1136_v53 = vand.u32 (!%p194_p2), 127, %v365_v51  ;;  %p248_p4 = scmp.lt.s32.totalorder (!%p194_p2), %s1021_s19, 1 }
   0x8   : > { %900 = vmatprep.subr.bf16.mxu0 (!%p194_p2), %v899_v3  ;;  %v265_v13 = vld [vmem:[%s1323_s1 + $0x58] sm:$0xff] (!%p194_p2)  ;;  %932 = vmatprep.subr.bf16.mxu1 (!%p194_p2), %v899_v3  ;;  %v905_v14 = vpack.c.bf16 (!%p194_p2), %v260_v11, %v258_v10  ;;  %v262_v16 = vld [vmem:[%s1323_s1 + $0x40] sm:$0xff] (!%p194_p2)  ;;  %v264_v17 = vld [vmem:[%s1323_s1 + $0x50] sm:$0xff] (!%p194_p2) }
   0x9   : > { %902 = vmatpush1.bf16.msra.mxu0 (!%p194_p2), %v901_v8  ;;  %934 = vmatpush1.bf16.xpose.msra.mxu1 (!%p194_p2), %v901_v8  ;;  %v907_v15 = vpack.c.bf16 (!%p194_p2), %v265_v13, %v263_v12  ;;  %v267_v18 = vld [vmem:[%s1323_s1 + $0x68] sm:$0xff] (!%p194_p2)  ;;  %v269_v19 = vld [vmem:[%s1323_s1 + $0x78] sm:$0xff] (!%p194_p2)  ;;  %v909_v20 = vpack.c.bf16 (!%p194_p2), %v264_v17, %v262_v16  ;;  %v266_v22 = vld [vmem:[%s1323_s1 + $0x60] sm:$0xff] (!%p194_p2)  ;;  %v367_v54 = vsub.s32 (!%p194_p2), 0, %v366_v52  ;;  %v371_v56 = vsub.s32 (!%p194_p2), 1, %v366_v52 }
   0xa   : > { %904 = vmatprep.subr.bf16.mxu0 (!%p194_p2), %v903_v9  ;;  %936 = vmatprep.subr.bf16.mxu1 (!%p194_p2), %v903_v9  ;;  %v911_v21 = vpack.c.bf16 (!%p194_p2), %v269_v19, %v267_v18  ;;  %v268_v23 = vld [vmem:[%s1323_s1 + $0x70] sm:$0xff] (!%p194_p2)  ;;  %v271_v24 = vld [vmem:[%s1323_s1 + $0x88] sm:$0xff] (!%p194_p2)  ;;  %v273_v25 = vld [vmem:[%s1323_s1 + $0x98] sm:$0xff] (!%p194_p2)  ;;  %v1142_v57 = vadd.s32 (!%p194_p2), 128, %v1136_v53  ;;  %vm384_vm0 = vcmp.lt.s32.totalorder (!%p194_p2), %v1136_v53, 64  ;;  %vm448_vm2 = vcmp.ge.s32.totalorder (!%p194_p2), %v1136_v53, 64 }
   0xb   : > { %v913_v26 = vpack.c.bf16 (!%p194_p2), %v268_v23, %v266_v22  ;;  %v915_v27 = vpack.c.bf16 (!%p194_p2), %v273_v25, %v271_v24  ;;  %v270_v28 = vld [vmem:[%s1323_s1 + $0x80] sm:$0xff] (!%p194_p2)  ;;  %v272_v29 = vld [vmem:[%s1323_s1 + $0x90] sm:$0xff] (!%p194_p2)  ;;  %v275_v30 = vld [vmem:[%s1323_s1 + $0xa8] sm:$0xff] (!%p194_p2)  ;;  %v388_v62 = vsel (!%p194_p2), %vm384_vm0, 0.0, %v984_v61  ;;  %v454_v3 = vsel (!%p194_p2), %vm448_vm2, 0.0, %v984_v61 }
   0xc   : > { %v277_v31 = vld [vmem:[%s1323_s1 + $0xb8] sm:$0xff] (!%p194_p2)  ;;  %v917_v32 = vpack.c.bf16 (!%p194_p2), %v272_v29, %v270_v28  ;;  %v274_v34 = vld [vmem:[%s1323_s1 + $0xa0] sm:$0xff] (!%p194_p2)  ;;  %v276_v35 = vld [vmem:[%s1323_s1 + $0xb0] sm:$0xff] (!%p194_p2)  ;;  %vm519_vm1 = vcmp.lt.s32.totalorder (!%p194_p2), %v1142_v57, 192  ;;  %vm584_vm3 = vcmp.ge.s32.totalorder (!%p194_p2), %v1142_v57, 192 }
   0xd   : > { %906 = vmatpush1.bf16.msra.mxu0 %v905_v14  ;;  %v919_v33 = vpack.c.bf16 %v277_v31, %v275_v30  ;;  %v279_v36 = vld [vmem:[%s1323_s1 + $0xc8] sm:$0xff]  ;;  %v281_v37 = vld [vmem:[%s1323_s1 + $0xd8] sm:$0xff]  ;;  %v921_v38 = vpack.c.bf16 %v276_v35, %v274_v34  ;;  %v278_v40 = vld [vmem:[%s1323_s1 + $0xc0] sm:$0xff]  ;;  %s1329_s16 = smov (!%p231_p3, %s885_s16), 3  ;;  %v523_v1 = vsel %vm519_vm1, 0.0, %v984_v61  ;;  %v590_v6 = vsel %vm584_vm3, 0.0, %v984_v61 }
   0xe   : > { %908 = vmatprep.subr.bf16.mxu0 %v907_v15  ;;  %v923_v39 = vpack.c.bf16 %v281_v37, %v279_v36  ;;  %v280_v41 = vld [vmem:[%s1323_s1 + $0xd0] sm:$0xff]  ;;  %v283_v42 = vld [vmem:[%s1323_s1 + $0xe8] sm:$0xff]  ;;  %v285_v43 = vld [vmem:[%s1323_s1 + $0xf8] sm:$0xff]  ;;  %s1123_s14 = sshll.u32 %s1329_s16, 3  ;;  %v894_v30 = vadd.s32 4294967168, %v1136_v53  ;;  %v896_v34 = vadd.s32 4294967104, %v1142_v57 }
   0xf   : > { %v925_v44 = vpack.c.bf16 %v280_v41, %v278_v40  ;;  %v927_v45 = vpack.c.bf16 %v285_v43, %v283_v42  ;;  %v282_v46 = vld [vmem:[%s1323_s1 + $0xe0] sm:$0xff]  ;;  %v284_v47 = vld [vmem:[%s1323_s1 + $0xf0] sm:$0xff]  ;;  %s234_s20 = scalar_lea.vmem %s1322_s0, %s1123_s14  ;;  %v892_v35 = vadd.s32 4294967232, %v1136_v53  ;;  %v893_v36 = vadd.s32 4294967232, %v1142_v57  ;;  %s1278_s24 = scalar_lea.vmem %s1326_s4, %s1123_s14 }
  0x10   : > { %v929_v48 = vpack.c.bf16 %v284_v47, %v282_v46  ;;  %v1129_v49 = vld [vmem:[%s234_s20] sm:$0xff]  ;;  %v1133_v50 = vld [vmem:[%s234_s20 + $0x8] sm:$0xff]  ;;  %s240_s27 = scalar_lea.vmem %s1325_s3, %s1123_s14  ;;  %s1331_s19 = smov (!%p248_p4, %s1021_s19), 1 }
  0x11   : > { %910 = vmatpush1.bf16.msra.mxu0 %v909_v20  ;;  %938 = vmatpush1.bf16.xpose.msra.mxu1 %v905_v14  ;;  %v286_v55 = vld [vmem:[%s1324_s2] sm:$0x3]  ;;  %s891_s28 = sshll.u32 %s1331_s19, 3 }
  0x12   : > { %912 = vmatprep.subr.bf16.mxu0 %v911_v21  ;;  %940 = vmatprep.subr.bf16.mxu1 %v907_v15  ;;  %v368_v58 = vrot.slane %v286_v55, %v367_v54  ;;  %v372_v59 = vrot.slane %v286_v55, %v371_v56  ;;  %s251_s6 = scalar_lea.vmem %s1327_s5, %s891_s28 }
  0x15   : > { %914 = vmatpush1.bf16.msra.mxu0 %v913_v26 }
  0x16   : > { %916 = vmatprep.subr.bf16.mxu0 %v915_v27 }
  0x19   : > { %918 = vmatpush1.bf16.msra.mxu0 %v917_v32  ;;  %942 = vmatpush1.bf16.xpose.msra.mxu1 %v909_v20 }
  0x1a   : > { %920 = vmatprep.subr.bf16.mxu0 %v919_v33  ;;  %944 = vmatprep.subr.bf16.mxu1 %v911_v21 }
  0x1d   : > { %922 = vmatpush1.bf16.msra.mxu0 %v921_v38 }
  0x1e   : > { %924 = vmatprep.subr.bf16.mxu0 %v923_v39 }
  0x21   : > { %926 = vmatpush1.bf16.msra.mxu0 %v925_v44  ;;  %946 = vmatpush1.bf16.xpose.msra.mxu1 %v913_v26 }
  0x22   : > { %928 = vmatprep.subr.bf16.mxu0 %v927_v45  ;;  %948 = vmatprep.subr.bf16.mxu1 %v915_v27 }
  0x25   : > { %930 = vmatpush1.bf16.msra.mxu0 %v929_v48 }
  0x28   : > { %352 = vmatmul.mubr.f32.vlgmr.msra.gmra.mrb[0].mxu0 %v1129_v49 }
  0x29   : > { %357 = vmatprep.mubr.f32.mxu0 %v983_v7  ;;  %950 = vmatpush1.bf16.xpose.msra.mxu1 %v917_v32 }
  0x2a   : > { %952 = vmatprep.subr.bf16.mxu1 %v919_v33  ;;  %v895_v33 = vadd.s32 4294967104, %v1136_v53 }
  0x2c   : > { %358 = vmatmul.mubr.f32.gmra.mrb[2].mxu0 %v1133_v50 }
  0x31   : > { %954 = vmatpush1.bf16.xpose.msra.mxu1 %v921_v38 }
  0x32   : > { %956 = vmatprep.subr.bf16.mxu1 %v923_v39 }
  0x39   : > { %958 = vmatpush1.bf16.xpose.msra.mxu1 %v925_v44 }
  0x3a   : > { %960 = vmatprep.subr.bf16.mxu1 %v927_v45 }
  0x41   : > { %962 = vmatpush1.bf16.xpose.msra.mxu1 %v929_v48 }
  0xfb   : > { %v353_v60 = vpop.f32.mrb[0].mxu0 }
  0xfc   : > { %v375_v63 = vsub.f32 %v368_v58, %v353_v60  ;;  %v355_v0 = vpop.f32.mrb[1].mxu0 }
  0xfd   : > { %v376_v2 = vsub.f32 %v372_v59, %v355_v0 }
  0xfe   : > { %v524_v4 = vadd.f32 inf, %v375_v63  ;;  %v390_v5 = vadd.f32 %v388_v62, %v375_v63  ;;  %v456_v13 = vadd.f32 %v454_v3, %v375_v63 }
  0xff   : > { %v391_v8 = vadd.f32 inf, %v376_v2  ;;  %v525_v9 = vadd.f32 %v523_v1, %v376_v2  ;;  %v359_v10 = vpop.f32.mrb[2].mxu0  ;;  %v592_v17 = vadd.f32 %v590_v6, %v376_v2 }
 0x100   : > { %v377_v11 = vsub.f32 %v368_v58, %v359_v10  ;;  %v361_v12 = vpop.f32.mrb[3].mxu0 }
 0x101   : > { %v528_v14 = vmin.f32 %v524_v4, %v525_v9  ;;  %v394_v15 = vmin.f32 %v390_v5, %v391_v8  ;;  %v378_v16 = vsub.f32 %v372_v59, %v361_v12  ;;  %v595_v21 = vmin.f32 %v524_v4, %v592_v17 }
 0x102   : > { %v458_v19 = vadd.f32 %v454_v3, %v377_v11  ;;  %v392_v20 = vadd.f32 %v388_v62, %v377_v11  ;;  %v460_v22 = vmin.f32 %v456_v13, %v391_v8  ;;  %v1148_v25 = vadd.f32 inf, %v377_v11 }
 0x103   : > { %529 = vmin.xlane.f32.xlu1 %v528_v14  ;;  %395 = vmin.xlane.f32.xlu0 %v394_v15  ;;  %v393_v18 = vadd.f32 inf, %v378_v16  ;;  %v1150_v26 = vadd.f32 %v590_v6, %v378_v16  ;;  %v1152_v27 = vadd.f32 %v523_v1, %v378_v16 }
 0x105   : > { %v463_v23 = vmin.f32 %v458_v19, %v393_v18  ;;  %v397_v24 = vmin.f32 %v392_v20, %v393_v18  ;;  %v598_v28 = vmin.f32 %v1148_v25, %v1150_v26  ;;  %v531_v29 = vmin.f32 %v1148_v25, %v1152_v27 }
 0x107   : > { %596 = vmin.xlane.f32.xlu1 %v595_v21  ;;  %461 = vmin.xlane.f32.xlu0 %v460_v22 }
 0x10b   : > { %464 = vmin.xlane.f32.xlu1 %v463_v23  ;;  %398 = vmin.xlane.f32.xlu0 %v397_v24 }
 0x10f   : > { %599 = vmin.xlane.f32.xlu1 %v598_v28  ;;  %532 = vmin.xlane.f32.xlu0 %v531_v29 }
 0x190   : > { %v530_v31 = vpop.xlane.xlu1 %529  ;;  %v396_v32 = vpop.xlane.xlu0 %395 }
 0x191   : > { %vm534_vm4 = vcmp.le.f32.partialorder %v524_v4, %v530_v31  ;;  %vm535_vm5 = vcmp.le.f32.partialorder %v525_v9, %v530_v31  ;;  %vm400_vm6 = vcmp.le.f32.partialorder %v390_v5, %v396_v32  ;;  %vm401_vm7 = vcmp.le.f32.partialorder %v391_v8, %v396_v32 }
 0x192   : > { %v1163_v37 = vsel %vm534_vm4, %v894_v30, 64  ;;  %v1166_v38 = vsel %vm535_vm5, %v1136_v53, 64  ;;  %v1169_v39 = vsel %vm400_vm6, %v1136_v53, 64  ;;  %v1172_v40 = vsel %vm401_vm7, %v1142_v57, 64 }
 0x193   : > { %vm408_vm8 = vcmp.lt.s32.totalorder %v1169_v39, %v1172_v40  ;;  %vm543_vm9 = vcmp.lt.s32.totalorder %v1163_v37, %v1166_v38 }
 0x194   : > { %v597_v41 = vpop.xlane.xlu1 %596  ;;  %v462_v42 = vpop.xlane.xlu0 %461  ;;  %v1180_v43 = vsel %vm408_vm8, %v1169_v39, %v1172_v40  ;;  %v544_v55 = vsel %vm543_vm9, %v1163_v37, %v1166_v38 }
 0x195   : > { %vm601_vm10 = vcmp.le.f32.partialorder %v524_v4, %v597_v41  ;;  %vm602_vm11 = vcmp.le.f32.partialorder %v592_v17, %v597_v41  ;;  %vm466_vm12 = vcmp.le.f32.partialorder %v456_v13, %v462_v42  ;;  %vm467_vm13 = vcmp.le.f32.partialorder %v391_v8, %v462_v42 }
 0x196   : > { %v1182_v44 = vsel %vm601_vm10, %v895_v33, 64  ;;  %v1184_v45 = vsel %vm602_vm11, %v896_v34, 64  ;;  %v1186_v46 = vsel %vm466_vm12, %v892_v35, 64  ;;  %v1188_v47 = vsel %vm467_vm13, %v893_v36, 64 }
 0x197   : > { %vm476_vm14 = vcmp.lt.s32.totalorder %v1186_v46, %v1188_v47  ;;  %v411_v48 = vshra.s32 %v1180_v43, 16  ;;  %vm611_vm15 = vcmp.lt.s32.totalorder %v1182_v44, %v1184_v45  ;;  %v546_v63 = vshra.s32 %v544_v55, 16 }
 0x198   : > { %v465_v51 = vpop.xlane.xlu1 %464  ;;  %v399_v52 = vpop.xlane.xlu0 %398  ;;  %v477_v54 = vsel %vm476_vm14, %v1186_v46, %v1188_v47  ;;  %v612_v2 = vsel %vm611_vm15, %v1182_v44, %v1184_v45  ;;  %v410_v23 = vand.u32 65535, %v1180_v43 }
 0x199   : > { %vm468_vm0 = vcmp.le.f32.partialorder %v458_v19, %v465_v51  ;;  %vm469_vm1 = vcmp.le.f32.partialorder %v393_v18, %v465_v51  ;;  %vm402_vm2 = vcmp.le.f32.partialorder %v392_v20, %v399_v52  ;;  %vm403_vm3 = vcmp.le.f32.partialorder %v393_v18, %v399_v52 }
 0x19a   : > { %v1202_v56 = vsel %vm468_vm0, %v892_v35, 64  ;;  %v1204_v58 = vsel %vm469_vm1, %v893_v36, 64  ;;  %v1207_v59 = vsel %vm402_vm2, %v1136_v53, 64  ;;  %v1210_v60 = vsel %vm403_vm3, %v1142_v57, 64 }
 0x19b   : > { %vm424_vm4 = vcmp.lt.s32.totalorder %v1207_v59, %v1210_v60  ;;  %v413_v61 = vcvt.s32.f32 %v411_v48  ;;  %v479_v62 = vshra.s32 %v477_v54, 16  ;;  %vm492_vm5 = vcmp.lt.s32.totalorder %v1202_v56, %v1204_v58 }
 0x19c   : > { %v600_v0 = vpop.xlane.xlu1 %599  ;;  %v533_v1 = vpop.xlane.xlu0 %532  ;;  %v425_v57 = vsel %vm424_vm4, %v1207_v59, %v1210_v60  ;;  %v548_v9 = vcvt.s32.f32 %v546_v63  ;;  %v614_v10 = vshra.s32 %v612_v2, 16  ;;  %v493_v12 = vsel %vm492_vm5, %v1202_v56, %v1204_v58 }
 0x19d   : > { %414 = vmin.xlane.f32.xlu0 %v413_v61  ;;  %vm603_vm6 = vcmp.le.f32.partialorder %v1148_v25, %v600_v0  ;;  %vm604_vm7 = vcmp.le.f32.partialorder %v1150_v26, %v600_v0  ;;  %vm536_vm8 = vcmp.le.f32.partialorder %v1148_v25, %v533_v1  ;;  %vm537_vm9 = vcmp.le.f32.partialorder %v1152_v27, %v533_v1 }
 0x19e   : > { %v1227_v3 = vsel %vm603_vm6, %v895_v33, 64  ;;  %v1229_v4 = vsel %vm604_vm7, %v896_v34, 64  ;;  %v1231_v5 = vsel %vm536_vm8, %v894_v30, 64  ;;  %v1234_v6 = vsel %vm537_vm9, %v1136_v53, 64 }
 0x19f   : > { %vm559_vm10 = vcmp.lt.s32.totalorder %v1231_v5, %v1234_v6  ;;  %v481_v8 = vcvt.s32.f32 %v479_v62  ;;  %v427_v11 = vshra.s32 %v425_v57, 16  ;;  %vm627_vm11 = vcmp.lt.s32.totalorder %v1227_v3, %v1229_v4 }
 0x1a0   : > { %v560_v13 = vsel %vm559_vm10, %v1231_v5, %v1234_v6  ;;  %v616_v16 = vcvt.s32.f32 %v614_v10  ;;  %v495_v17 = vshra.s32 %v493_v12, 16  ;;  %v628_v18 = vsel %vm627_vm11, %v1227_v3, %v1229_v4 }
 0x1a1   : > { %482 = vmin.xlane.f32.xlu1 %v481_v8  ;;  %549 = vmin.xlane.f32.xlu0 %v548_v9  ;;  %v562_v14 = vshra.s32 %v560_v13, 16  ;;  %v429_v15 = vcvt.s32.f32 %v427_v11  ;;  %v630_v21 = vshra.s32 %v628_v18, 16  ;;  %v412_v25 = vcvt.s32.f32 %v410_v23 }
 0x1a2   : > { %v497_v20 = vcvt.s32.f32 %v495_v17  ;;  %v478_v26 = vand.u32 65535, %v477_v54  ;;  %v545_v27 = vand.u32 65535, %v544_v55  ;;  %v613_v33 = vand.u32 65535, %v612_v2 }
 0x1a3   : > { %v564_v19 = vcvt.s32.f32 %v562_v14  ;;  %v632_v22 = vcvt.s32.f32 %v630_v21  ;;  %v426_v34 = vand.u32 65535, %v425_v57  ;;  %v494_v51 = vand.u32 65535, %v493_v12 }
 0x1a4   : > { %v480_v31 = vcvt.s32.f32 %v478_v26  ;;  %v547_v32 = vcvt.s32.f32 %v545_v27  ;;  %v615_v43 = vcvt.s32.f32 %v613_v33  ;;  %v561_v52 = vand.u32 65535, %v560_v13 }
 0x1a5   : > { %617 = vmin.xlane.f32.xlu1 %v616_v16  ;;  %430 = vmin.xlane.f32.xlu0 %v429_v15  ;;  %v428_v48 = vcvt.s32.f32 %v426_v34  ;;  %v496_v63 = vcvt.s32.f32 %v494_v51  ;;  %v629_v1 = vand.u32 65535, %v628_v18  ;;  %vm728_vm4 = vcmp.eq.s32.totalorder %v1136_v53, 0 }
 0x1a6   : > { %v563_v0 = vcvt.s32.f32 %v561_v52  ;;  %vm731_vm6 = vcmp.eq.s32.totalorder %v1136_v53, 1  ;;  %vm734_vm8 = vcmp.eq.s32.totalorder %v1136_v53, 2  ;;  %vm737_vm9 = vcmp.eq.s32.totalorder %v1136_v53, 3 }
 0x1a7   : > { %vm740_vm10 = vcmask 31744  }
 0x1a9   : > { %498 = vmin.xlane.f32.xlu1 %v497_v20  ;;  %565 = vmin.xlane.f32.xlu0 %v564_v19 }
 0x1ad   : > { %633 = vmin.xlane.f32.xlu1 %v632_v22 }
 0x22a   : > { %v415_v24 = vpop.xlane.xlu0 %414 }
 0x22b   : > { %vm416_vm12 = vcmp.eq.f32.partialorder %v413_v61, %v415_v24  ;;  %v421_v11 = vcvt.f32.s32 %v415_v24 }
 0x22c   : > { %v417_v28 = vsel %vm416_vm12, %v412_v25, inf }
 0x22d   : > { %418 = vmin.xlane.f32.xlu0 %v417_v28 }
 0x22e   : > { %v483_v29 = vpop.xlane.xlu1 %482  ;;  %v550_v30 = vpop.xlane.xlu0 %549 }
 0x22f   : > { %vm484_vm13 = vcmp.eq.f32.partialorder %v481_v8, %v483_v29  ;;  %vm551_vm14 = vcmp.eq.f32.partialorder %v548_v9, %v550_v30  ;;  %v631_v9 = vcvt.s32.f32 %v629_v1  ;;  %v489_v12 = vcvt.f32.s32 %v483_v29 }
 0x230   : > { %v485_v35 = vsel %vm484_vm13, %v480_v31, inf  ;;  %v552_v36 = vsel %vm551_vm14, %v547_v32, inf  ;;  %v556_v13 = vcvt.f32.s32 %v550_v30 }
 0x231   : > { %486 = vmin.xlane.f32.xlu1 %v485_v35  ;;  %553 = vmin.xlane.f32.xlu0 %v552_v36 }
 0x232   : > { %v618_v41 = vpop.xlane.xlu1 %617  ;;  %v431_v42 = vpop.xlane.xlu0 %430  ;;  %v557_v21 = vshll.u32 %v556_v13, 16 }
 0x233   : > { %vm619_vm15 = vcmp.eq.f32.partialorder %v616_v16, %v618_v41  ;;  %vm432_vm0 = vcmp.eq.f32.partialorder %v429_v15, %v431_v42  ;;  %v624_v14 = vcvt.f32.s32 %v618_v41  ;;  %v422_v16 = vshll.u32 %v421_v11, 16 }
 0x234   : > { %v620_v54 = vsel %vm619_vm15, %v615_v43, inf  ;;  %v433_v55 = vsel %vm432_vm0, %v428_v48, inf  ;;  %v437_v17 = vcvt.f32.s32 %v431_v42 }
 0x235   : > { %621 = vmin.xlane.f32.xlu1 %v620_v54  ;;  %434 = vmin.xlane.f32.xlu0 %v433_v55  ;;  %v625_v23 = vshll.u32 %v624_v14, 16 }
 0x236   : > { %v499_v61 = vpop.xlane.xlu1 %498  ;;  %v1250_v62 = vpop.xlane.xlu0 %565  ;;  %v438_v27 = vshll.u32 %v437_v17, 16 }
 0x237   : > { %vm500_vm1 = vcmp.eq.f32.partialorder %v497_v20, %v499_v61  ;;  %vm567_vm2 = vcmp.eq.f32.partialorder %v564_v19, %v1250_v62  ;;  %v490_v20 = vshll.u32 %v489_v12, 16  ;;  %v505_v24 = vcvt.f32.s32 %v499_v61 }
 0x238   : > { %v501_v2 = vsel %vm500_vm1, %v496_v63, inf  ;;  %v568_v57 = vsel %vm567_vm2, %v563_v0, inf  ;;  %v572_v29 = vcvt.f32.s32 %v1250_v62 }
 0x239   : > { %502 = vmin.xlane.f32.xlu1 %v501_v2  ;;  %569 = vmin.xlane.f32.xlu0 %v568_v57  ;;  %v506_v55 = vshll.u32 %v505_v24, 16 }
 0x23a   : > { %v1253_v8 = vpop.xlane.xlu1 %633 }
 0x23b   : > { %vm635_vm3 = vcmp.eq.f32.partialorder %v632_v22, %v1253_v8 }
 0x23c   : > { %v636_v10 = vsel %vm635_vm3, %v631_v9, inf }
 0x23d   : > { %637 = vmin.xlane.f32.xlu1 %v636_v10 }
 0x2ba   : > { %v419_v15 = vpop.xlane.xlu0 %418 }
 0x2bb   : > { %v420_v18 = vcvt.f32.s32 %v419_v15 }
 0x2bd   : > { %v423_v19 = vadd.s32 %v422_v16, %v420_v18 }
 0x2be   : > { %v487_v25 = vpop.xlane.xlu1 %486  ;;  %v554_v26 = vpop.xlane.xlu0 %553 }
 0x2bf   : > { %v488_v22 = vcvt.f32.s32 %v487_v25  ;;  %v555_v28 = vcvt.f32.s32 %v554_v26  ;;  %vm441_vm5 = vcmp.eq.s32.totalorder %v1172_v40, %v423_v19  ;;  %vm440_vm7 = vcmp.eq.s32.totalorder %v1169_v39, %v423_v19 }
 0x2c0   : > { %v729_v32 = vsel %vm728_vm4, %v423_v19, 0  ;;  %v445_v34 = vsel %vm441_vm5, 1.0, %v983_v7  ;;  %v444_v35 = vsel %vm440_vm7, 1.0, %v983_v7 }
 0x2c1   : > { %v491_v30 = vadd.s32 %v490_v20, %v488_v22  ;;  %v558_v31 = vadd.s32 %v557_v21, %v555_v28 }
 0x2c2   : > { %v622_v33 = vpop.xlane.xlu1 %621  ;;  %v435_v40 = vpop.xlane.xlu0 %434 }
 0x2c3   : > { %v732_v39 = vsel %vm731_vm6, %v491_v30, %v729_v32  ;;  %v623_v36 = vcvt.f32.s32 %v622_v33  ;;  %v436_v41 = vcvt.f32.s32 %v435_v40  ;;  %vm509_vm11 = vcmp.eq.s32.totalorder %v1188_v47, %v491_v30 }
 0x2c4   : > { %v735_v42 = vsel %vm734_vm8, %v558_v31, %v732_v39  ;;  %v513_v43 = vsel %vm509_vm11, 1.0, %v445_v34  ;;  %vm576_vm12 = vcmp.eq.s32.totalorder %v1166_v38, %v558_v31  ;;  %vm508_vm13 = vcmp.eq.s32.totalorder %v1186_v46, %v491_v30 }
 0x2c5   : > { %v626_v48 = vadd.s32 %v625_v23, %v623_v36  ;;  %v439_v51 = vadd.s32 %v438_v27, %v436_v41  ;;  %v580_v52 = vsel %vm576_vm12, 1.0, %v513_v43  ;;  %v512_v54 = vsel %vm508_vm13, 1.0, %v444_v35 }
 0x2c6   : > { %v640_v47 = vcvt.f32.s32 %v1253_v8  ;;  %v503_v61 = vpop.xlane.xlu1 %502  ;;  %v570_v62 = vpop.xlane.xlu0 %569  ;;  %vm575_vm14 = vcmp.eq.s32.totalorder %v1163_v37, %v558_v31  ;;  %v573_v38 = vshll.u32 %v572_v29, 16 }
 0x2c7   : > { %v738_v46 = vsel %vm737_vm9, %v626_v48, %v735_v42  ;;  %v504_v63 = vcvt.f32.s32 %v503_v61  ;;  %v571_v0 = vcvt.f32.s32 %v570_v62  ;;  %vm644_vm15 = vcmp.eq.s32.totalorder %v1184_v45, %v626_v48 }
 0x2c8   : > { %741 = vst.msk [vmem:[%s1278_s24] sm:$0xff] %vm740_vm10, %v738_v46  ;;  %v579_v1 = vsel %vm575_vm14, 1.0, %v512_v54  ;;  %vm643_vm0 = vcmp.eq.s32.totalorder %v1182_v44, %v626_v48  ;;  %vm443_vm1 = vcmp.eq.s32.totalorder %v1210_v60, %v439_v51  ;;  %v648_v8 = vsel %vm644_vm15, 1.0, %v580_v52 }
 0x2c9   : > { %v507_v2 = vadd.s32 %v506_v55, %v504_v63  ;;  %v574_v57 = vadd.s32 %v573_v38, %v571_v0  ;;  %v647_v9 = vsel %vm643_vm0, 1.0, %v579_v1  ;;  %v641_v37 = vshll.u32 %v640_v47, 16  ;;  %715 = vmatprep.mubr.f32.mxu1 %v648_v8 }
 0x2ca   : > { %v730_v10 = vsel %vm728_vm4, %v439_v51, 0  ;;  %v638_v11 = vpop.xlane.xlu1 %637  ;;  %v447_v12 = vsel %vm443_vm1, 1.0, %v983_v7  ;;  %vm442_vm2 = vcmp.eq.s32.totalorder %v1207_v59, %v439_v51  ;;  %716 = vmatmul.mubr.f32.vlgmr.msra.gmra.mrb[0].mxu1 %v647_v9 }
 0x2cb   : > { %v733_v45 = vsel %vm731_vm6, %v507_v2, %v730_v10  ;;  %v639_v44 = vcvt.f32.s32 %v638_v11  ;;  %vm511_vm3 = vcmp.eq.s32.totalorder %v1204_v58, %v507_v2  ;;  %vm578_vm5 = vcmp.eq.s32.totalorder %v1234_v6, %v574_v57 }
 0x2cc   : > { %v515_v60 = vsel %vm511_vm3, 1.0, %v447_v12  ;;  %v446_v13 = vsel %vm442_vm2, 1.0, %v983_v7  ;;  %vm510_vm4 = vcmp.eq.s32.totalorder %v1202_v56, %v507_v2  ;;  %vm577_vm7 = vcmp.eq.s32.totalorder %v1231_v5, %v574_v57 }
 0x2cd   : > { %v642_v14 = vadd.s32 %v641_v37, %v639_v44  ;;  %v514_v15 = vsel %vm510_vm4, 1.0, %v446_v13  ;;  %v736_v59 = vsel %vm734_vm8, %v574_v57, %v733_v45  ;;  %v582_v16 = vsel %vm578_vm5, 1.0, %v515_v60 }
 0x2ce   : > { %v581_v58 = vsel %vm577_vm7, 1.0, %v514_v15 }
 0x2cf   : > { %v739_v17 = vsel %vm737_vm9, %v642_v14, %v736_v59  ;;  %vm646_vm6 = vcmp.eq.s32.totalorder %v1229_v4, %v642_v14  ;;  %vm645_vm11 = vcmp.eq.s32.totalorder %v1227_v3, %v642_v14 }
 0x2d0   : > { %742 = vst.msk [vmem:[%s1278_s24 + $0x8] sm:$0xff] %vm740_vm10, %v739_v17  ;;  %v650_v7 = vsel %vm646_vm6, 1.0, %v582_v16  ;;  %v649_v56 = vsel %vm645_vm11, 1.0, %v581_v58 }
 0x2d1   : > { %720 = vmatprep.mubr.f32.mxu1 %v650_v7 }
 0x2d2   : > { %721 = vmatmul.mubr.f32.gmra.mrb[2].mxu1 %v649_v56 }
 0x39d   : > { %v717_v5 = vpop.f32.mrb[0].mxu1 }
 0x39e   : > { %726 = vst [vmem:[%s240_s27] sm:$0xff] %v717_v5  ;;  %v719_v6 = vpop.f32.mrb[1].mxu1  ;;  %v743_v53 = vsub.f32 %v717_v5, %v1129_v49 }
 0x3a0   : > { %v745_v19 = vmul.f32 %v743_v53, %v743_v53 }
 0x3a5   : > { %v722_v18 = vpop.f32.mrb[2].mxu1 }
 0x3a6   : > { %727 = vst [vmem:[%s240_s27 + $0x8] sm:$0xff] %v722_v18  ;;  %v744_v3 = vsub.f32 %v722_v18, %v1133_v50  ;;  %v724_v4 = vpop.f32.mrb[3].mxu1 }
 0x3a8   : > { %v746_v20 = vmul.f32 %v744_v3, %v744_v3 }
 0x3aa   : > { %v747_v21 = vadd.f32 %v746_v20, %v745_v19 }
 0x3ac   : > { %748 = vadd.xlane.f32.xlu0 %v747_v21 }
 0x439   : > { %v749_v23 = vpop.xlane.xlu0 %748 }
 0x43a   : > { %v750_v25 = vrot.slane %v749_v23, 4 }
 0x43c   : > { %v751_v26 = vadd.f32 %v750_v25, %v749_v23 }
 0x43e   : > { %v752_v27 = vrot.slane %v751_v26, 2 }
 0x440   : > { %v753_v22 = vadd.f32 %v752_v27, %v751_v26 }
 0x442   : > { %v754_v28 = vrot.slane %v753_v22, 1 }
 0x444   : > { %v755_v24 = vadd.f32 %v754_v28, %v753_v22 }
 0x446   : > { %963 = vpush %v755_v24 }
 0x477   : > { %s964_s7 = spop %963 }
 0x478   : > { %v757_v49 = vstv %s964_s7 }
 0x479   : > { %758 = vst [vmem:[%s251_s6] sm:$0xff] %v757_v49 }
 0x47a PF: > { %s16_s18 = sadd.s32 1, %s981_s18  }
 0x47b   : > { %p13_p5 = scmp.ge.s32.totalorder %s16_s18, 4  }
 0x47d   :  { %15 = sbr.rel (!%p13_p5) target bundleno = 1 (0x1), region = 86 }

</bundles_post_ra>
